<compile_context>
chip_gen: v6e
topology: v6e:2x2x1
jax: 0.10.0
libtpu: 0.0.40
codegen_flags: <defaults>
</compile_context>

<pallas_src>
import jax
import jax.numpy as jnp
from jax.experimental import pallas as pl
from jax.experimental.pallas import tpu as pltpu

JOINT_DIM, GRIPPER_DIM, EE_DIM = 7, 1, 6
HIDDEN = 64   # extra_hidden_size
EMBED = 32    # extra_embedding_size

MODALITIES = [("joint_states", JOINT_DIM),
              ("gripper_states", GRIPPER_DIM),
              ("ee_states", EE_DIM)]
NMOD = len(MODALITIES)
H_FUSED = NMOD * HIDDEN                     # 192
E_FUSED = NMOD * EMBED                      # 96

MAX_M_BLK = 2048


def _fused_mlp_kernel(xj_ref, xg_ref, xe_ref,
                      w1j_ref, w1g_ref, w1e_ref, b1_ref,
                      w2_ref, b2_ref, w3_ref, b3_ref,
                      o_ref):
    # MXU operands in bf16; accumulation and all VPU math (bias, ReLU,
    # gripper broadcast) in f32 (v5e VPU has no bf16).
    xj = xj_ref[...].astype(jnp.bfloat16)                       # (m, 7)
    xe = xe_ref[...].astype(jnp.bfloat16)                       # (m, 6)
    h1 = jnp.dot(xj, w1j_ref[...], preferred_element_type=jnp.float32)
    h1 = h1 + jnp.dot(xe, w1e_ref[...], preferred_element_type=jnp.float32)
    h1 = h1 + xg_ref[...] * w1g_ref[...]        # K=1 "matmul" -> VPU broadcast
    h1 = h1 + b1_ref[...]
    h2 = jnp.dot(h1.astype(jnp.bfloat16), w2_ref[...],
                 preferred_element_type=jnp.float32) + b2_ref[...]
    h2 = jnp.maximum(h2, 0.0)                   # ReLU (extra_num_layers=2 path)
    o = jnp.dot(h2.astype(jnp.bfloat16), w3_ref[...],
                preferred_element_type=jnp.float32) + b3_ref[...]
    o_ref[...] = o.astype(o_ref.dtype)


def init_params(key):
    """Per-modality params mimicking PyTorch nn.Linear default init.

    Stored as (in, out) matrices (transposed vs torch's (out, in))."""
    params = {}
    for name, d in MODALITIES:
        layer_dims = [(d, HIDDEN), (HIDDEN, HIDDEN), (HIDDEN, EMBED)]
        layers = []
        for (fin, fout) in layer_dims:
            key, kw, kb = jax.random.split(key, 3)
            bound = 1.0 / jnp.sqrt(float(fin))
            w = jax.random.uniform(kw, (fin, fout), jnp.float32, -bound, bound)
            b = jax.random.uniform(kb, (fout,), jnp.float32, -bound, bound)
            layers += [w, b]
        params[name] = tuple(layers)
    return params


def fuse_params(params):
    """Build fused block-diagonal weights ONCE (hoisted out of the forward).

    First-layer weights are kept per-modality (so the inputs need no concat)
    but each is laid into its own 64-wide column block of the fused 192-wide
    hidden; off-block columns are exact zeros.  W2/W3 are block-diagonal.
    MXU weights are stored in bf16; biases and the gripper row (VPU path)
    stay f32.
    """
    w1_blocks = {}
    w2 = jnp.zeros((H_FUSED, H_FUSED), jnp.float32)
    w3 = jnp.zeros((H_FUSED, E_FUSED), jnp.float32)
    b1s, b2s, b3s = [], [], []
    for m, (name, d) in enumerate(MODALITIES):
        pw1, pb1, pw2, pb2, pw3, pb3 = params[name]
        blk = jnp.zeros((d, H_FUSED), jnp.float32)
        blk = blk.at[:, m * HIDDEN:(m + 1) * HIDDEN].set(pw1)
        w1_blocks[name] = blk
        w2 = w2.at[m * HIDDEN:(m + 1) * HIDDEN,
                   m * HIDDEN:(m + 1) * HIDDEN].set(pw2)
        w3 = w3.at[m * HIDDEN:(m + 1) * HIDDEN,
                   m * EMBED:(m + 1) * EMBED].set(pw3)
        b1s.append(pb1); b2s.append(pb2); b3s.append(pb3)

    w1j = w1_blocks["joint_states"].astype(jnp.bfloat16)   # (7, 192)  MXU
    w1g = w1_blocks["gripper_states"]                       # (1, 192)  VPU f32
    w1e = w1_blocks["ee_states"].astype(jnp.bfloat16)       # (6, 192)  MXU
    b1 = jnp.concatenate(b1s)[None, :]                      # (1, 192)  f32
    b2 = jnp.concatenate(b2s)[None, :]                      # (1, 192)  f32
    b3 = jnp.concatenate(b3s)[None, :]                      # (1, 96)   f32
    return (w1j, w1g, w1e, b1,
            w2.astype(jnp.bfloat16), b2,
            w3.astype(jnp.bfloat16), b3)


def _round_up(x, m):
    return ((x + m - 1) // m) * m


def _choose_m_blk(M):
    """Row-tile size: <= MAX_M_BLK, multiple of 8; for large M force >= 2
    (roughly even) grid steps so v7x's two TensorCores both get work."""
    if M <= 1024:
        return M                       # single grid step; block == full array
    tile_pairs = pl.cdiv(M, 2 * MAX_M_BLK)
    m_blk = _round_up(pl.cdiv(M, 2 * tile_pairs), 8)
    return min(m_blk, MAX_M_BLK)


def extra_modality_tokens_forward(obs_dict, fused_params):
    """obs_dict: {'joint_states': (B,T,7), 'gripper_states': (B,T,1),
                  'ee_states': (B,T,6)}  ->  (B, T, 3, EMBED)"""
    B, T, _ = obs_dict["joint_states"].shape
    M = B * T

    # Free views only (no concat, no extra HBM pass).
    xj = obs_dict["joint_states"].reshape(M, JOINT_DIM).astype(jnp.float32)
    xg = obs_dict["gripper_states"].reshape(M, GRIPPER_DIM).astype(jnp.float32)
    xe = obs_dict["ee_states"].reshape(M, EE_DIM).astype(jnp.float32)

    w1j, w1g, w1e, b1, w2, b2, w3, b3 = fused_params

    m_blk = _choose_m_blk(M)
    grid_m = pl.cdiv(M, m_blk)
    const = lambda i: (0, 0)

    out = pl.pallas_call(
        _fused_mlp_kernel,
        out_shape=jax.ShapeDtypeStruct((M, E_FUSED), jnp.float32),
        grid_spec=pltpu.PrefetchScalarGridSpec(
            num_scalar_prefetch=0,
            grid=(grid_m,),
            in_specs=[
                pl.BlockSpec((m_blk, JOINT_DIM), lambda i: (i, 0)),
                pl.BlockSpec((m_blk, GRIPPER_DIM), lambda i: (i, 0)),
                pl.BlockSpec((m_blk, EE_DIM), lambda i: (i, 0)),
                pl.BlockSpec((JOINT_DIM, H_FUSED), const),
                pl.BlockSpec((GRIPPER_DIM, H_FUSED), const),
                pl.BlockSpec((EE_DIM, H_FUSED), const),
                pl.BlockSpec((1, H_FUSED), const),
                pl.BlockSpec((H_FUSED, H_FUSED), const),
                pl.BlockSpec((1, H_FUSED), const),
                pl.BlockSpec((H_FUSED, E_FUSED), const),
                pl.BlockSpec((1, E_FUSED), const),
            ],
            out_specs=pl.BlockSpec((m_blk, E_FUSED), lambda i: (i, 0)),
        ),
        compiler_params=pltpu.CompilerParams(
            dimension_semantics=("parallel",),
            vmem_limit_bytes=32 << 20),
    )(xj, xg, xe, w1j, w1g, w1e, b1, w2, b2, w3, b3)

    # (M, 3*EMBED) -> (B, T, 3, EMBED): free row-major view; modality is the
    # slow sub-axis of the 96-lane block == torch.stack([j, g, e], dim=-2).
    return out.reshape(B, T, NMOD, EMBED)


def _reference(obs_dict, params):
    outs = []
    for name, _ in MODALITIES:
        w1, b1, w2, b2, w3, b3 = params[name]
        x = obs_dict[name].astype(jnp.float32)
        h = x @ w1 + b1
        h = jnp.maximum(h @ w2 + b2, 0.0)
        outs.append(h @ w3 + b3)
    return jnp.stack(outs, axis=-2)


if __name__ == "__main__":
    key = jax.random.PRNGKey(0)
    kp, kj, kg, ke = jax.random.split(key, 4)

    B, T = 2, 8
    obs_dict = {
        "joint_states": jax.random.normal(kj, (B, T, JOINT_DIM), jnp.float32),
        "gripper_states": jax.random.normal(kg, (B, T, GRIPPER_DIM), jnp.float32),
        "ee_states": jax.random.normal(ke, (B, T, EE_DIM), jnp.float32),
    }
    params = init_params(kp)
    fused = fuse_params(params)          # once, outside the forward path

    out = extra_modality_tokens_forward(obs_dict, fused)
    out = jax.block_until_ready(out)

    ref = _reference(obs_dict, params)
    assert out.shape == (B, T, NMOD, EMBED), out.shape
    # bf16 MXU operands with f32 accumulation -> relaxed tolerance vs the
    # pure-f32 reference (typical error ~1e-2 absolute for these dims).
    assert jnp.allclose(out, ref, atol=5e-2, rtol=5e-2), "mismatch vs reference"

    print("KERNEL_OK")
</pallas_src>

<mosaic_0001>
module attributes {stable_mosaic.version = 11 : i64} {
  func.func @_fused_mlp_kernel(%arg0: i32, %arg1: memref<16x7xf32, #tpu.memory_space<vmem>>, %arg2: memref<16x1xf32, #tpu.memory_space<vmem>>, %arg3: memref<16x6xf32, #tpu.memory_space<vmem>>, %arg4: memref<7x192xbf16, #tpu.memory_space<vmem>>, %arg5: memref<1x192xf32, #tpu.memory_space<vmem>>, %arg6: memref<6x192xbf16, #tpu.memory_space<vmem>>, %arg7: memref<1x192xf32, #tpu.memory_space<vmem>>, %arg8: memref<192x192xbf16, #tpu.memory_space<vmem>>, %arg9: memref<1x192xf32, #tpu.memory_space<vmem>>, %arg10: memref<192x96xbf16, #tpu.memory_space<vmem>>, %arg11: memref<1x96xf32, #tpu.memory_space<vmem>>, %arg12: memref<16x96xf32, #tpu.memory_space<vmem>>) attributes {dimension_semantics = [#tpu.dimension_semantics<parallel>], iteration_bounds = array<i64: 1>, scalar_prefetch = 0 : i64, scratch_operands = 0 : i64, tpu.core_type = #tpu.core_type<tc>, window_params = [{transform_indices = @transform_0, window_bounds = array<i64: 16, 7>}, {transform_indices = @transform_1, window_bounds = array<i64: 16, 1>}, {transform_indices = @transform_2, window_bounds = array<i64: 16, 6>}, {pipeline_mode = #tpu.pipeline_mode<synchronous>, transform_indices = @transform_3, window_bounds = array<i64: 7, 192>}, {pipeline_mode = #tpu.pipeline_mode<synchronous>, transform_indices = @transform_4, window_bounds = array<i64: 1, 192>}, {pipeline_mode = #tpu.pipeline_mode<synchronous>, transform_indices = @transform_5, window_bounds = array<i64: 6, 192>}, {pipeline_mode = #tpu.pipeline_mode<synchronous>, transform_indices = @transform_6, window_bounds = array<i64: 1, 192>}, {pipeline_mode = #tpu.pipeline_mode<synchronous>, transform_indices = @transform_7, window_bounds = array<i64: 192, 192>}, {pipeline_mode = #tpu.pipeline_mode<synchronous>, transform_indices = @transform_8, window_bounds = array<i64: 1, 192>}, {pipeline_mode = #tpu.pipeline_mode<synchronous>, transform_indices = @transform_9, window_bounds = array<i64: 192, 96>}, {pipeline_mode = #tpu.pipeline_mode<synchronous>, transform_indices = @transform_10, window_bounds = array<i64: 1, 96>}, {transform_indices = @transform_11, window_bounds = array<i64: 16, 96>}]} {
    %c0 = arith.constant 0 : index
    %c0_0 = arith.constant 0 : index
    %0 = vector.load %arg1[%c0, %c0_0] : memref<16x7xf32, #tpu.memory_space<vmem>>, vector<16x7xf32>
    %1 = arith.truncf %0 : vector<16x7xf32> to vector<16x7xbf16>
    %c0_1 = arith.constant 0 : index
    %c0_2 = arith.constant 0 : index
    %2 = vector.load %arg3[%c0_1, %c0_2] : memref<16x6xf32, #tpu.memory_space<vmem>>, vector<16x6xf32>
    %3 = arith.truncf %2 : vector<16x6xf32> to vector<16x6xbf16>
    %c0_3 = arith.constant 0 : index
    %c0_4 = arith.constant 0 : index
    %4 = vector.load %arg4[%c0_3, %c0_4] : memref<7x192xbf16, #tpu.memory_space<vmem>>, vector<7x192xbf16>
    %cst = arith.constant dense<0.000000e+00> : vector<16x192xf32>
    %5 = tpu.matmul %1, %4, %cst {dimension_numbers = #tpu.dot_dimension_numbers<[1], [0], [0], [1], [0, 0, 1, 1], [], []>} : vector<16x7xbf16>, vector<7x192xbf16>, vector<16x192xf32> -> vector<16x192xf32>
    %c0_5 = arith.constant 0 : index
    %c0_6 = arith.constant 0 : index
    %6 = vector.load %arg6[%c0_5, %c0_6] : memref<6x192xbf16, #tpu.memory_space<vmem>>, vector<6x192xbf16>
    %cst_7 = arith.constant dense<0.000000e+00> : vector<16x192xf32>
    %7 = tpu.matmul %3, %6, %cst_7 {dimension_numbers = #tpu.dot_dimension_numbers<[1], [0], [0], [1], [0, 0, 1, 1], [], []>} : vector<16x6xbf16>, vector<6x192xbf16>, vector<16x192xf32> -> vector<16x192xf32>
    %8 = arith.addf %5, %7 : vector<16x192xf32>
    %c0_8 = arith.constant 0 : index
    %c0_9 = arith.constant 0 : index
    %9 = vector.load %arg2[%c0_8, %c0_9] : memref<16x1xf32, #tpu.memory_space<vmem>>, vector<16x1xf32>
    %c0_10 = arith.constant 0 : index
    %c0_11 = arith.constant 0 : index
    %10 = vector.load %arg5[%c0_10, %c0_11] : memref<1x192xf32, #tpu.memory_space<vmem>>, vector<1x192xf32>
    %11 = vector.broadcast %9 : vector<16x1xf32> to vector<16x192xf32>
    %12 = vector.broadcast %10 : vector<1x192xf32> to vector<16x192xf32>
    %13 = arith.mulf %11, %12 : vector<16x192xf32>
    %14 = arith.addf %8, %13 : vector<16x192xf32>
    %c0_12 = arith.constant 0 : index
    %c0_13 = arith.constant 0 : index
    %15 = vector.load %arg7[%c0_12, %c0_13] : memref<1x192xf32, #tpu.memory_space<vmem>>, vector<1x192xf32>
    %16 = vector.broadcast %15 : vector<1x192xf32> to vector<16x192xf32>
    %17 = arith.addf %14, %16 : vector<16x192xf32>
    %18 = arith.truncf %17 : vector<16x192xf32> to vector<16x192xbf16>
    %c0_14 = arith.constant 0 : index
    %c0_15 = arith.constant 0 : index
    %19 = vector.load %arg8[%c0_14, %c0_15] : memref<192x192xbf16, #tpu.memory_space<vmem>>, vector<192x192xbf16>
    %cst_16 = arith.constant dense<0.000000e+00> : vector<16x192xf32>
    %20 = tpu.matmul %18, %19, %cst_16 {dimension_numbers = #tpu.dot_dimension_numbers<[1], [0], [0], [1], [0, 0, 1, 1], [], []>} : vector<16x192xbf16>, vector<192x192xbf16>, vector<16x192xf32> -> vector<16x192xf32>
    %c0_17 = arith.constant 0 : index
    %c0_18 = arith.constant 0 : index
    %21 = vector.load %arg9[%c0_17, %c0_18] : memref<1x192xf32, #tpu.memory_space<vmem>>, vector<1x192xf32>
    %22 = vector.broadcast %21 : vector<1x192xf32> to vector<16x192xf32>
    %23 = arith.addf %20, %22 : vector<16x192xf32>
    %cst_19 = arith.constant 0.000000e+00 : f32
    %24 = vector.broadcast %cst_19 : f32 to vector<16x192xf32>
    %25 = arith.maximumf %23, %24 : vector<16x192xf32>
    %26 = arith.truncf %25 : vector<16x192xf32> to vector<16x192xbf16>
    %c0_20 = arith.constant 0 : index
    %c0_21 = arith.constant 0 : index
    %27 = vector.load %arg10[%c0_20, %c0_21] : memref<192x96xbf16, #tpu.memory_space<vmem>>, vector<192x96xbf16>
    %cst_22 = arith.constant dense<0.000000e+00> : vector<16x96xf32>
    %28 = tpu.matmul %26, %27, %cst_22 {dimension_numbers = #tpu.dot_dimension_numbers<[1], [0], [0], [1], [0, 0, 1, 1], [], []>} : vector<16x192xbf16>, vector<192x96xbf16>, vector<16x96xf32> -> vector<16x96xf32>
    %c0_23 = arith.constant 0 : index
    %c0_24 = arith.constant 0 : index
    %29 = vector.load %arg11[%c0_23, %c0_24] : memref<1x96xf32, #tpu.memory_space<vmem>>, vector<1x96xf32>
    %30 = vector.broadcast %29 : vector<1x96xf32> to vector<16x96xf32>
    %31 = arith.addf %28, %30 : vector<16x96xf32>
    %c0_25 = arith.constant 0 : index
    %c0_26 = arith.constant 0 : index
    %32 = vector.load %arg12[%c0_25, %c0_26] : memref<16x96xf32, #tpu.memory_space<vmem>>, vector<16x96xf32>
    tpu.vector_store %arg12[%c0_25, %c0_26], %31 {strides = array<i32>} : memref<16x96xf32, #tpu.memory_space<vmem>>, vector<16x96xf32>,
    return
  }
  func.func @transform_0(%arg0: i32) -> (i32, i32) {
    %c0_i32 = arith.constant 0 : i32
    %c0_i32_0 = arith.constant 0 : i32
    return %arg0, %c0_i32 : i32, i32
  }
  func.func @transform_1(%arg0: i32) -> (i32, i32) {
    %c0_i32 = arith.constant 0 : i32
    %c0_i32_0 = arith.constant 0 : i32
    return %arg0, %c0_i32 : i32, i32
  }
  func.func @transform_2(%arg0: i32) -> (i32, i32) {
    %c0_i32 = arith.constant 0 : i32
    %c0_i32_0 = arith.constant 0 : i32
    return %arg0, %c0_i32 : i32, i32
  }
  func.func @transform_3(%arg0: i32) -> (i32, i32) {
    %c0_i32 = arith.constant 0 : i32
    %c0_i32_0 = arith.constant 0 : i32
    %c0_i32_1 = arith.constant 0 : i32
    return %c0_i32, %c0_i32_0 : i32, i32
  }
  func.func @transform_4(%arg0: i32) -> (i32, i32) {
    %c0_i32 = arith.constant 0 : i32
    %c0_i32_0 = arith.constant 0 : i32
    %c0_i32_1 = arith.constant 0 : i32
    return %c0_i32, %c0_i32_0 : i32, i32
  }
  func.func @transform_5(%arg0: i32) -> (i32, i32) {
    %c0_i32 = arith.constant 0 : i32
    %c0_i32_0 = arith.constant 0 : i32
    %c0_i32_1 = arith.constant 0 : i32
    return %c0_i32, %c0_i32_0 : i32, i32
  }
  func.func @transform_6(%arg0: i32) -> (i32, i32) {
    %c0_i32 = arith.constant 0 : i32
    %c0_i32_0 = arith.constant 0 : i32
    %c0_i32_1 = arith.constant 0 : i32
    return %c0_i32, %c0_i32_0 : i32, i32
  }
  func.func @transform_7(%arg0: i32) -> (i32, i32) {
    %c0_i32 = arith.constant 0 : i32
    %c0_i32_0 = arith.constant 0 : i32
    %c0_i32_1 = arith.constant 0 : i32
    return %c0_i32, %c0_i32_0 : i32, i32
  }
  func.func @transform_8(%arg0: i32) -> (i32, i32) {
    %c0_i32 = arith.constant 0 : i32
    %c0_i32_0 = arith.constant 0 : i32
    %c0_i32_1 = arith.constant 0 : i32
    return %c0_i32, %c0_i32_0 : i32, i32
  }
  func.func @transform_9(%arg0: i32) -> (i32, i32) {
    %c0_i32 = arith.constant 0 : i32
    %c0_i32_0 = arith.constant 0 : i32
    %c0_i32_1 = arith.constant 0 : i32
    return %c0_i32, %c0_i32_0 : i32, i32
  }
  func.func @transform_10(%arg0: i32) -> (i32, i32) {
    %c0_i32 = arith.constant 0 : i32
    %c0_i32_0 = arith.constant 0 : i32
    %c0_i32_1 = arith.constant 0 : i32
    return %c0_i32, %c0_i32_0 : i32, i32
  }
  func.func @transform_11(%arg0: i32) -> (i32, i32) {
    %c0_i32 = arith.constant 0 : i32
    %c0_i32_0 = arith.constant 0 : i32
    return %arg0, %c0_i32 : i32, i32
  }
}

</mosaic_0001>

<bundles_post_ra>
// kernel: tpu_custom_call.1
= control target key start
LH: loop header
LB: loop body
LE: loop exit
PB: predicated region body
PF: predicated region fallthrough
CT: control target
= control target key end

     0   :  { %16 = vsyncpa [#allocation3], 0  ;;  %s937_s0 = inlined_call_operand.vmem [shape: f32[16,7], index: 0, kind: input, shape index: {}]   ;;  %s938_s1 = inlined_call_operand.vmem [shape: f32[16,1], index: 1, kind: input, shape index: {}]   ;;  %s939_s2 = inlined_call_operand.vmem [shape: f32[16,6], index: 2, kind: input, shape index: {}]   ;;  %s940_s3 = inlined_call_operand.vmem [shape: bf16[7,192], index: 3, kind: input, shape index: {}]   ;;  %s941_s4 = inlined_call_operand.vmem [shape: f32[1,192], index: 4, kind: input, shape index: {}]   ;;  %s942_s5 = inlined_call_operand.vmem [shape: bf16[6,192], index: 5, kind: input, shape index: {}]   ;;  %s943_s6 = inlined_call_operand.vmem [shape: f32[1,192], index: 6, kind: input, shape index: {}]   ;;  %s944_s7 = inlined_call_operand.hbm [shape: bf16[192,192], index: 7, kind: input, shape index: {}]   ;;  %s945_s8 = inlined_call_operand.vmem [shape: f32[1,192], index: 8, kind: input, shape index: {}]   ;;  %s946_s9 = inlined_call_operand.hbm [shape: bf16[192,96], index: 9, kind: input, shape index: {}]   ;;  %s947_s10 = inlined_call_operand.vmem [shape: f32[1,96], index: 10, kind: input, shape index: {}]   ;;  %s948_s11 = inlined_call_operand.hbm [shape: f32[16,96], index: 11, kind: output, shape index: {}]  }
   0x1   :  { %17 = vsyncpa [#allocation6], 0 }
   0x2   :  { %18 = vsyncpa [#allocation4], 0  ;;  %s797_s17 = smov [#allocation2]  }
   0x3   :  { %s38_s18 = sshll.u32 %s797_s17, 4  ;;  %s39_s18 = int_to_ptr.vmem [resolvable:$true] %s38_s18 }
   0x4   :  { %s739_s19 = scalar_lea.vmem %s39_s18, 3072  ;;  %p744_p1 = scmp.lt.s32.totalorder %s39_s18, %s39_s18 }
   0x5   :  { %p740_p0 = scmp.ne.s32.totalorder %s39_s18, %s739_s19  ;;  %p745_p2 = scmp.lt.s32.totalorder %s739_s19, %s739_s19 }
   0x7   :  { %p746_p3 = por %p745_p2, %p744_p1 }
   0x9   :  { %p747_p4 = pnand %p746_p3, %p740_p0 }
   0xb   :  { %750 = shalt.err (!%p747_p4)
}
   0xc   :  { %s798_s20 = smov 128   ;;  %s799_s21 = smov 8  }
   0xd   :  { %44 = dma.hbm_to_vmem [thread:$0]  %s944_s7, 3072, %s39_s18, [#allocation3], %s798_s20, %s798_s20, %s799_s21  }
   0xe   :  { %s800_s24 = smov [#allocation5]  }
   0xf   :  { %s52_s25 = sshll.u32 %s800_s24, 4  ;;  %s53_s25 = int_to_ptr.vmem [resolvable:$true] %s52_s25 }
  0x10   :  { %s759_s26 = scalar_lea.vmem %s53_s25, 1536  ;;  %p764_p6 = scmp.lt.s32.totalorder %s53_s25, %s53_s25 }
  0x11   :  { %p760_p5 = scmp.ne.s32.totalorder %s53_s25, %s759_s26  ;;  %p765_p7 = scmp.lt.s32.totalorder %s759_s26, %s759_s26 }
  0x13   :  { %p766_p8 = por %p765_p7, %p764_p6 }
  0x15   :  { %p767_p9 = pnand %p766_p8, %p760_p5 }
  0x17   :  { %770 = shalt.err (!%p767_p9)
}
  0x18   :  { %s801_s27 = smov 64   ;;  %s802_s28 = smov 4  }
  0x19   :  { %58 = dma.hbm_to_vmem [thread:$0]  %s946_s9, 1536, %s53_s25, [#allocation6], %s801_s27, %s801_s27, %s802_s28  }
  0x1a   :  { %791 = dma.done.wait [#allocation3], 3072  }
  0x1b   :  { %792 = vsyncadd [#allocation3], 4294964224 }
  0x1c   :  { %793 = dma.done.wait [#allocation6], 1536  }
  0x1d   :  { %794 = vsyncadd [#allocation6], 4294965760  ;;  %vm85_vm0 = vcmask 1042432   ;;  %v803_v0 = vmov 0   ;;  %vm144_vm1 = vcmask 1043456   ;;  %v804_v1 = vmov 65535  }
  0x1e   :  { %124 = vmatprep.mubr.bf16.mxu0 %v803_v0  ;;  %185 = vmatprep.mubr.bf16.mxu1 %v803_v0  ;;  %v145_v2 = vsel %vm85_vm0, 4294967295, %v804_v1  ;;  %v75_v3 = vld [vmem:[%s942_s5] sm:$0x77]  ;;  %v72_v11 = vld [vmem:[%s939_s2 + $0x8] sm:$0xff]  ;;  %v685_v20 = vld [vmem:[#allocation2 + $0x74] ss:$8 sps:$4 sm:$0xff]   ;;  %v210_v54 = vlaneseq }
  0x1f   :  { %678 = vset.pattern.permute.xlu0 %v803_v0  ;;  %v74_v4 = vld [vmem:[%s940_s3] sm:$0xff]  ;;  %v146_v5 = vsel %vm144_vm1, %v145_v2, 0  ;;  %v624_v7 = vcombine.high %v75_v3, %v75_v3  ;;  %v623_v8 = vcombine.low %v75_v3, %v75_v3  ;;  %v69_v13 = vld [vmem:[%s937_s0 + $0x8] sm:$0xff]  ;;  %vm81_vm2 = vcmask 48128   ;;  %v683_v21 = vld [vmem:[#allocation2 + $0x70] ss:$8 sps:$4 sm:$0xff]  }
  0x20   :  { %v71_v6 = vld [vmem:[%s939_s2] sm:$0xff]  ;;  %v628_v9 = vcombine.high %v74_v4, %v74_v4  ;;  %v627_v10 = vcombine.low %v74_v4, %v74_v4  ;;  %v197_v19 = vld [vmem:[%s938_s1 + $0x8] sm:$0xff]  ;;  %vm140_vm3 = vcmask 56320   ;;  %v691_v25 = vld [vmem:[#allocation2 + $0x54] ss:$8 sps:$4 sm:$0xff]   ;;  %v211_v55 = vshrl.u32 %v210_v54, 7 }
  0x21   :  { %v68_v12 = vld [vmem:[%s937_s0] sm:$0xff]  ;;  %625 = vmatprep.subr.msk.bf16.mxu0 %vm85_vm0, %v624_v7  ;;  %v87_v15 = vsel %vm85_vm0, %v623_v8, 0  ;;  %v73_v18 = vpack.c.bf16 %v72_v11, %v71_v6  ;;  %v689_v26 = vld [vmem:[#allocation2 + $0x50] ss:$8 sps:$4 sm:$0xff]   ;;  %v697_v29 = vld [vmem:[#allocation2 + $0x34] ss:$8 sps:$4 sm:$0xff]  }
  0x22   :  { %v196_v14 = vld [vmem:[%s938_s1] sm:$0xff]  ;;  %v151_v16 = vand.u32 %v628_v9, %v146_v5  ;;  %v148_v17 = vand.u32 %v627_v10, %v146_v5  ;;  %107 = vmatpush1.bf16.msra.mxu0 %v87_v15  ;;  %v70_v22 = vpack.c.bf16 %v69_v13, %v68_v12  ;;  %v695_v30 = vld [vmem:[#allocation2 + $0x30] ss:$8 sps:$4 sm:$0xff]   ;;  %v703_v33 = vld [vmem:[#allocation2 + $0x14] ss:$8 sps:$4 sm:$0xff]   ;;  %v216_v56 = vsub.s32 1, %v211_v55 }
  0x23   :  { %201 = vperm.xlu0 %678, %v196_v14   ;;  %406 = vmatprep.subr.bf16.mxu0 %v685_v20  ;;  %v688_v23 = vld [vmem:[#allocation2 + $0x64] ss:$8 sps:$4 sm:$0xff]   ;;  %v686_v24 = vld [vmem:[#allocation2 + $0x60] ss:$8 sps:$4 sm:$0xff]   ;;  %v701_v34 = vld [vmem:[#allocation2 + $0x10] ss:$8 sps:$4 sm:$0xff]  }
  0x24   :  { %167 = vmatprep.subr.bf16.mxu1 %v151_v16  ;;  %v694_v27 = vld [vmem:[#allocation2 + $0x44] ss:$8 sps:$4 sm:$0xff]   ;;  %v692_v28 = vld [vmem:[#allocation2 + $0x40] ss:$8 sps:$4 sm:$0xff]   ;;  %v709_v37 = vld [vmem:[#allocation2 + $0xb4] ss:$8 sps:$4 sm:$0xff]  }
  0x25   :  { %168 = vmatpush1.bf16.msra.mxu1 %v148_v17  ;;  %626 = vmatmul.mubr.msk.bf16.vlgmr.msra.gmra.mxu0 %vm81_vm2, %v73_v18  ;;  %v700_v31 = vld [vmem:[#allocation2 + $0x24] ss:$8 sps:$4 sm:$0xff]   ;;  %v698_v32 = vld [vmem:[#allocation2 + $0x20] ss:$8 sps:$4 sm:$0xff]   ;;  %v707_v38 = vld [vmem:[#allocation2 + $0xb0] ss:$8 sps:$4 sm:$0xff]  }
  0x26   :  { %407 = vmatpush1.bf16.msra.mxu0 %v683_v21  ;;  %561 = vmatprep.subr.bf16.mxu1 %v803_v0  ;;  %v706_v35 = vld [vmem:[#allocation2 + $0x4] ss:$8 sps:$4 sm:$0xff]   ;;  %v704_v36 = vld [vmem:[#allocation2] ss:$8 sps:$4 sm:$0xff]   ;;  %v715_v41 = vld [vmem:[#allocation2 + $0x94] ss:$8 sps:$4 sm:$0xff]  }
  0x27   :  { %206 = vperm.xlu0 %678, %v197_v19   ;;  %408 = vmatprep.subr.bf16.mxu0 %v688_v23  ;;  %v712_v39 = vld [vmem:[#allocation2 + $0xa4] ss:$8 sps:$4 sm:$0xff]   ;;  %v710_v40 = vld [vmem:[#allocation2 + $0xa0] ss:$8 sps:$4 sm:$0xff]   ;;  %v713_v42 = vld [vmem:[#allocation2 + $0x90] ss:$8 sps:$4 sm:$0xff]  }
  0x28   :  { %629 = vmatmul.mubr.msk.bf16.vlgmr.msra.gmra.mxu1 %vm140_vm3, %v70_v22  ;;  %v718_v43 = vld [vmem:[#allocation2 + $0x84] ss:$8 sps:$4 sm:$0xff]   ;;  %v716_v44 = vld [vmem:[#allocation2 + $0x80] ss:$8 sps:$4 sm:$0xff]   ;;  %v719_v45 = vld [vmem:[#allocation5 + $0x38] sm:$0xff]   ;;  %v212_v58 = vsub.s32 0, %v211_v55 }
  0x29   :  { %562 = vmatpush1.bf16.msra.mxu1 %v719_v45  ;;  %v720_v46 = vld [vmem:[#allocation5 + $0x30] sm:$0xff]   ;;  %v721_v47 = vld [vmem:[#allocation5 + $0x28] sm:$0xff]   ;;  %v722_v48 = vld [vmem:[#allocation5 + $0x20] sm:$0xff]   ;;  %vm402_vm4 = vcmask 523264   ;;  %vm602_vm5 = vcmask 785408   ;;  %s805_s28 = smov [#allocation7]  }
  0x2a   :  { %409 = vmatpush1.bf16.msra.mxu0 %v686_v24  ;;  %563 = vmatprep.subr.bf16.mxu1 %v803_v0  ;;  %v723_v49 = vld [vmem:[#allocation5 + $0x18] sm:$0xff]   ;;  %v724_v50 = vld [vmem:[#allocation5 + $0x10] sm:$0xff]   ;;  %v725_v51 = vld [vmem:[#allocation5 + $0x8] sm:$0xff]   ;;  %s610_s29 = sshll.u32 %s805_s28, 4  ;;  %s611_s29 = int_to_ptr.vmem [resolvable:$true] %s610_s29 }
  0x2b   :  { %410 = vmatprep.subr.bf16.mxu0 %v691_v25  ;;  %v726_v52 = vld [vmem:[#allocation5] sm:$0xff]   ;;  %v727_v53 = vld [vmem:[#allocation5 + $0x58] sm:$0xff]   ;;  %s771_s30 = scalar_lea.vmem %s611_s29, 256  ;;  %p776_p11 = scmp.lt.s32.totalorder %s611_s29, %s611_s29 }
  0x2c   :  { %v198_v59 = vld [vmem:[%s941_s4] sm:$0x3]  ;;  %p772_p10 = scmp.ne.s32.totalorder %s611_s29, %s771_s30  ;;  %p777_p12 = scmp.lt.s32.totalorder %s771_s30, %s771_s30 }
  0x2d   :  { %564 = vmatpush1.bf16.msra.mxu1 %v720_v46  ;;  %v217_v61 = vrot.slane %v198_v59, %v216_v56  ;;  %v213_v62 = vrot.slane %v198_v59, %v212_v58  ;;  %v228_v10 = vld [vmem:[%s943_s6] sm:$0x3] }
  0x2e   :  { %411 = vmatpush1.bf16.msra.mxu0 %v689_v26  ;;  %565 = vmatprep.subr.bf16.mxu1 %v803_v0  ;;  %v237_v13 = vrot.slane %v228_v10, %v216_v56  ;;  %v233_v21 = vrot.slane %v228_v10, %v212_v58  ;;  %p778_p13 = por %p777_p12, %p776_p11 }
  0x2f   :  { %412 = vmatprep.subr.bf16.mxu0 %v694_v27 }
  0x30   :  { %p779_p0 = pnand %p778_p13, %p772_p10 }
  0x31   :  { %566 = vmatpush1.bf16.msra.mxu1 %v721_v47 }
  0x32   :  { %413 = vmatpush1.bf16.msra.mxu0 %v692_v28  ;;  %567 = vmatprep.subr.bf16.mxu1 %v803_v0 }
  0x33   :  { %414 = vmatprep.subr.bf16.mxu0 %v697_v29  ;;  %v728_v29 = vld [vmem:[#allocation5 + $0x50] sm:$0xff]  }
  0x35   :  { %568 = vmatpush1.bf16.msra.mxu1 %v722_v48  ;;  %v655_v48 = vld [vmem:[%s947_s10] ss:$0 sm:$0xff] }
  0x36   :  { %415 = vmatpush1.bf16.msra.mxu0 %v695_v30  ;;  %569 = vmatprep.subr.bf16.mxu1 %v803_v0  ;;  %v729_v30 = vld [vmem:[#allocation5 + $0x48] sm:$0xff]  }
  0x37   :  { %416 = vmatprep.subr.bf16.mxu0 %v700_v31  ;;  %v730_v31 = vld [vmem:[#allocation5 + $0x40] sm:$0xff]  }
  0x39   :  { %570 = vmatpush1.bf16.msra.mxu1 %v723_v49 }
  0x3a   :  { %417 = vmatpush1.bf16.msra.mxu0 %v698_v32  ;;  %571 = vmatprep.subr.bf16.mxu1 %v803_v0  ;;  %v270_v32 = vld [vmem:[%s945_s8] sm:$0x3] }
  0x3b   :  { %418 = vmatprep.subr.bf16.mxu0 %v703_v33 }
  0x3d   :  { %572 = vmatpush1.bf16.msra.mxu1 %v724_v50 }
  0x3e   :  { %419 = vmatpush1.bf16.msra.mxu0 %v701_v34  ;;  %573 = vmatprep.subr.bf16.mxu1 %v803_v0  ;;  %v279_v34 = vrot.slane %v270_v32, %v216_v56 }
  0x3f   :  { %420 = vmatprep.subr.bf16.mxu0 %v706_v35  ;;  %v275_v35 = vrot.slane %v270_v32, %v212_v58 }
  0x41   :  { %574 = vmatpush1.bf16.msra.mxu1 %v725_v51 }
  0x42   :  { %421 = vmatpush1.bf16.msra.mxu0 %v704_v36  ;;  %575 = vmatprep.subr.bf16.mxu1 %v803_v0 }
  0x43   :  { %430 = vmatprep.subr.bf16.mxu0 %v709_v37 }
  0x45   :  { %576 = vmatpush1.bf16.msra.mxu1 %v726_v52 }
  0x46   :  { %431 = vmatpush2.bf16.msra.mxu0 %v707_v38  ;;  %585 = vmatprep.subr.bf16.mxu1 %v803_v0 }
  0x47   :  { %432 = vmatprep.subr.bf16.mxu0 %v712_v39 }
  0x49   :  { %586 = vmatpush2.bf16.msra.mxu1 %v727_v53 }
  0x4a   :  { %433 = vmatpush2.bf16.msra.mxu0 %v710_v40  ;;  %587 = vmatprep.subr.bf16.mxu1 %v803_v0 }
  0x4b   :  { %434 = vmatprep.subr.bf16.mxu0 %v715_v41 }
  0x4d   :  { %588 = vmatpush2.bf16.msra.mxu1 %v728_v29 }
  0x4e   :  { %435 = vmatpush2.bf16.msra.mxu0 %v713_v42  ;;  %589 = vmatprep.subr.bf16.mxu1 %v803_v0 }
  0x4f   :  { %436 = vmatprep.subr.bf16.mxu0 %v718_v43 }
  0x51   :  { %590 = vmatpush2.bf16.msra.mxu1 %v729_v30 }
  0x52   :  { %437 = vmatpush2.bf16.msra.mxu0 %v716_v44  ;;  %591 = vmatprep.subr.bf16.mxu1 %v803_v0 }
  0x55   :  { %592 = vmatpush2.bf16.msra.mxu1 %v730_v31 }
  0x9e   :  { %v202_v57 = vpop.permute.xlu0 %201 }
  0x9f   :  { %v221_v5 = vmul.f32 %v217_v61, %v202_v57  ;;  %v220_v7 = vmul.f32 %v213_v62, %v202_v57 }
  0xa2   :  { %v207_v2 = vpop.permute.xlu0 %206 }
  0xa3   :  { %v222_v11 = vmul.f32 %v213_v62, %v207_v2  ;;  %v223_v16 = vmul.f32 %v217_v61, %v207_v2 }
  0xe5   :  { %v126_v60 = vpop.f32.mrf.mxu0 }
  0xe7   :  { %v128_v63 = vpop.f32.mrf.mxu0 }
  0xe8   :  { %v187_v1 = vpop.f32.mrf.mxu1 }
  0xe9   :  { %v130_v3 = vpop.f32.mrf.mxu0  ;;  %v188_v8 = vadd.f32 %v187_v1, %v126_v60 }
  0xea   :  { %v189_v4 = vpop.f32.mrf.mxu1 }
  0xeb   :  { %v190_v6 = vadd.f32 %v189_v4, %v128_v63  ;;  %v132_v14 = vpop.f32.mrf.mxu0  ;;  %v224_v20 = vadd.f32 %v220_v7, %v188_v8 }
  0xec   :  { %v191_v9 = vpop.f32.mrf.mxu1 }
  0xed   :  { %v192_v12 = vadd.f32 %v191_v9, %v130_v3  ;;  %v225_v17 = vadd.f32 %v221_v5, %v190_v6  ;;  %v240_v26 = vadd.f32 %v233_v21, %v224_v20 }
  0xee   :  { %v193_v15 = vpop.f32.mrf.mxu1 }
  0xef   :  { %v226_v18 = vadd.f32 %v222_v11, %v192_v12  ;;  %v194_v19 = vadd.f32 %v193_v15, %v132_v14  ;;  %v241_v24 = vadd.f32 %v237_v13, %v225_v17 }
  0xf1   :  { %v227_v22 = vadd.f32 %v223_v16, %v194_v19  ;;  %v242_v23 = vadd.f32 %v233_v21, %v226_v18 }
  0xf3   :  { %v243_v25 = vadd.f32 %v237_v13, %v227_v22  ;;  %v244_v28 = vpack.c.bf16 %v242_v23, %v240_v26 }
  0xf5   :  { %v245_v27 = vpack.c.bf16 %v243_v25, %v241_v24 }
  0xf7   :  { %654 = vmatprep.mubr.msk.bf16.mxu0 %vm402_vm4, %v245_v27 }
  0xf8   :  { %439 = vmatmul.mubr.bf16.vlgmr.msra.gmra.mxu0 %v244_v28 }
 0x1b8   :  { %v440_v33 = vpop.f32.mrf.mxu0 }
 0x1b9   :  { %v441_v40 = vadd.f32 %v440_v33, %v275_v35 }
 0x1ba   :  { %v442_v36 = vpop.f32.mrf.mxu0 }
 0x1bb   :  { %v443_v38 = vadd.f32 %v442_v36, %v279_v34  ;;  %v449_v0 = vmax.f32 %v441_v40, 0.0 }
 0x1bc   :  { %v444_v37 = vpop.f32.mrf.mxu0 }
 0x1bd   :  { %v445_v39 = vadd.f32 %v444_v37, %v275_v35  ;;  %v450_v44 = vmax.f32 %v443_v38, 0.0 }
 0x1be   :  { %v446_v41 = vpop.f32.mrf.mxu0 }
 0x1bf   :  { %v447_v42 = vadd.f32 %v446_v41, %v279_v34  ;;  %v451_v43 = vmax.f32 %v445_v39, 0.0 }
 0x1c1   :  { %v452_v45 = vmax.f32 %v447_v42, 0.0  ;;  %v453_v47 = vpack.c.bf16 %v451_v43, %v449_v0 }
 0x1c3   :  { %v454_v46 = vpack.c.bf16 %v452_v45, %v450_v44 }
 0x1c5   :  { %668 = vmatprep.mubr.msk.bf16.mxu1 %vm402_vm4, %v454_v46 }
 0x1c6   :  { %594 = vmatmul.mubr.bf16.vlgmr.msra.gmra.mxu1 %v453_v47 }
 0x286   :  { %v595_v49 = vpop.f32.mrf.mxu1 }
 0x287   :  { %v596_v50 = vadd.f32 %v655_v48, %v595_v49 }
 0x288   :  { %v597_v51 = vpop.f32.mrf.mxu1 }
 0x289   :  { %603 = vst.msk [vmem:[#allocation7] sm:$0xff] %vm602_vm5, %v596_v50 }
 0x28a   :  { %v598_v52 = vpop.f32.mrf.mxu1 }
 0x28b   :  { %v599_v53 = vadd.f32 %v655_v48, %v598_v52 }
 0x28c   :  { %v600_v54 = vpop.f32.mrf.mxu1 }
 0x28d   :  { %604 = vst.msk [vmem:[#allocation7 + $0x8] sm:$0xff] %vm602_vm5, %v599_v53 }
 0x28e   :  { %782 = shalt.err (!%p779_p0)
}
 0x28f   :  { %616 = dma.vmem_to_hbm [thread:$0]  %s611_s29, 256, %s948_s11, [#allocation4], %s798_s20, %s798_s20, %s799_s21  }
 0x290   :  { %795 = dma.done.wait [#allocation4], 256  }
 0x291   :  { %796 = vsyncadd [#allocation4], 4294967040 }
 0x292   :  { %620 = vsyncpa [#allocation3], 1 }
 0x293   :  { %621 = vsyncpa [#allocation6], 1 }
 0x294   :  { %622 = vsyncpa [#allocation4], 1 }

</bundles_post_ra>
